<compile_context>
chip_gen: v6e
topology: v6e:2x2x1
jax: 0.10.0
libtpu: 0.0.40
codegen_flags: <defaults>
</compile_context>

<pallas_src>
import jax
import jax.numpy as jnp
from jax.experimental import pallas as pl
from jax.experimental.pallas import tpu as pltpu


def mlp_kernel(x_ref, w1_ref, b1_ref, w2_ref, b2_ref, o_ref):
    # hidden layer: (TILE_B, F) @ (F, H_pad) + (1, H_pad), then ReLU
    h = jnp.dot(x_ref[...], w1_ref[...], preferred_element_type=jnp.float32)
    h = jnp.maximum(h + b1_ref[...], 0.0)
    # prediction layer: (TILE_B, H_pad) @ (H_pad, O_pad) + (1, O_pad)
    out = jnp.dot(h, w2_ref[...], preferred_element_type=jnp.float32)
    o_ref[...] = (out + b2_ref[...]).astype(o_ref.dtype)


def _round_up(x, m):
    return (x + m - 1) // m * m


def net_forward(x, w1, b1, w2, b2, *, tile_b=256):
    """Batch-tiled Pallas forward.  Pads hidden/output dims to lane-aligned
    multiples of 128 (zero padding, numerically inert) and pads the batch to a
    multiple of the tile; weights stay resident in VMEM across grid steps."""
    B, F = x.shape
    H = w1.shape[1]
    O = w2.shape[1]

    H_pad = _round_up(H, 128)
    O_pad = _round_up(O, 128)

    # Tile the batch; for tiny batches use one full-batch tile (rounded up to
    # the 8-sublane granule).
    tb = min(tile_b, _round_up(B, 8))
    B_pad = _round_up(B, tb)

    xp = x if B_pad == B else jnp.pad(x, ((0, B_pad - B), (0, 0)))
    w1p = jnp.pad(w1, ((0, 0), (0, H_pad - H)))
    b1p = jnp.pad(b1.reshape(1, H), ((0, 0), (0, H_pad - H)))
    w2p = jnp.pad(w2, ((0, H_pad - H), (0, O_pad - O)))
    b2p = jnp.pad(b2.reshape(1, O), ((0, 0), (0, O_pad - O)))

    n_tiles = B_pad // tb
    flops = 2 * B_pad * F * H_pad + 2 * B_pad * H_pad * O_pad
    bytes_accessed = 4 * (B_pad * F + F * H_pad + H_pad + H_pad * O_pad + O_pad
                          + B_pad * O_pad)

    out = pl.pallas_call(
        mlp_kernel,
        out_shape=jax.ShapeDtypeStruct((B_pad, O_pad), jnp.float32),
        grid=(n_tiles,),
        in_specs=[
            # x: one batch tile per grid step (pipelined DMA).
            pl.BlockSpec((tb, F), lambda i: (i, 0)),
            # weights / biases: constant block index -> resident across steps.
            pl.BlockSpec((F, H_pad), lambda i: (0, 0)),
            pl.BlockSpec((1, H_pad), lambda i: (0, 0)),
            pl.BlockSpec((H_pad, O_pad), lambda i: (0, 0)),
            pl.BlockSpec((1, O_pad), lambda i: (0, 0)),
        ],
        out_specs=pl.BlockSpec((tb, O_pad), lambda i: (i, 0)),
        compiler_params=pltpu.CompilerParams(
            dimension_semantics=("parallel",)),
        cost_estimate=pl.CostEstimate(
            flops=flops, transcendentals=0, bytes_accessed=bytes_accessed),
    )(xp, w1p, b1p, w2p, b2p)

    return out[:B, :O]


def init_params(key, n_feature, n_hidden, n_output):
    """Deterministic init mimicking torch.nn.Linear defaults
    (uniform(-1/sqrt(fan_in), 1/sqrt(fan_in)))."""
    k1, k2, k3, k4 = jax.random.split(key, 4)
    bound1 = 1.0 / jnp.sqrt(jnp.float32(n_feature))
    bound2 = 1.0 / jnp.sqrt(jnp.float32(n_hidden))
    w1 = jax.random.uniform(k1, (n_feature, n_hidden), jnp.float32, -bound1, bound1)
    b1 = jax.random.uniform(k2, (1, n_hidden), jnp.float32, -bound1, bound1)
    w2 = jax.random.uniform(k3, (n_hidden, n_output), jnp.float32, -bound2, bound2)
    b2 = jax.random.uniform(k4, (1, n_output), jnp.float32, -bound2, bound2)
    return w1, b1, w2, b2


def _ref_forward(x, w1, b1, w2, b2):
    return jnp.maximum(x @ w1 + b1, 0.0) @ w2 + b2


if __name__ == "__main__":
    # Boston-housing style shapes: 13 features, 1 regression output.
    n_feature, n_hidden, n_output = 13, 100, 1

    key = jax.random.PRNGKey(0)
    kx, kp = jax.random.split(key)
    w1, b1, w2, b2 = init_params(kp, n_feature, n_hidden, n_output)

    # Small deterministic batch (single grid tile).
    batch = 32
    x = jax.random.normal(kx, (batch, n_feature), jnp.float32)
    out = jax.block_until_ready(net_forward(x, w1, b1, w2, b2))
    ref = _ref_forward(x, w1, b1, w2, b2)
    assert out.shape == (batch, n_output)
    assert jnp.allclose(out, ref, atol=1e-5), "mismatch vs reference (batch=32)"

    # Non-aligned tiny batch still handled correctly (padded to the sublane
    # granule inside the wrapper, padding sliced off).
    x_small = jax.random.normal(jax.random.PRNGKey(1), (7, n_feature), jnp.float32)
    out_small = jax.block_until_ready(net_forward(x_small, w1, b1, w2, b2))
    ref_small = _ref_forward(x_small, w1, b1, w2, b2)
    assert out_small.shape == (7, n_output)
    assert jnp.allclose(out_small, ref_small, atol=1e-5), "mismatch vs reference (batch=7)"

    print("KERNEL_OK")
</pallas_src>

<mosaic_0001>
module attributes {stable_mosaic.version = 11 : i64} {
  func.func @mlp_kernel(%arg0: i32, %arg1: memref<32x13xf32, #tpu.memory_space<vmem>>, %arg2: memref<13x128xf32, #tpu.memory_space<vmem>>, %arg3: memref<1x128xf32, #tpu.memory_space<vmem>>, %arg4: memref<128x128xf32, #tpu.memory_space<vmem>>, %arg5: memref<1x128xf32, #tpu.memory_space<vmem>>, %arg6: memref<32x128xf32, #tpu.memory_space<vmem>>) attributes {dimension_semantics = [#tpu.dimension_semantics<parallel>], iteration_bounds = array<i64: 1>, scalar_prefetch = 0 : i64, scratch_operands = 0 : i64, tpu.core_type = #tpu.core_type<tc>, window_params = [{transform_indices = @transform_0, window_bounds = array<i64: 32, 13>}, {pipeline_mode = #tpu.pipeline_mode<synchronous>, transform_indices = @transform_1, window_bounds = array<i64: 13, 128>}, {pipeline_mode = #tpu.pipeline_mode<synchronous>, transform_indices = @transform_2, window_bounds = array<i64: 1, 128>}, {pipeline_mode = #tpu.pipeline_mode<synchronous>, transform_indices = @transform_3, window_bounds = array<i64: 128, 128>}, {pipeline_mode = #tpu.pipeline_mode<synchronous>, transform_indices = @transform_4, window_bounds = array<i64: 1, 128>}, {transform_indices = @transform_5, window_bounds = array<i64: 32, 128>}]} {
    %c0 = arith.constant 0 : index
    %c0_0 = arith.constant 0 : index
    %0 = vector.load %arg1[%c0, %c0_0] : memref<32x13xf32, #tpu.memory_space<vmem>>, vector<32x13xf32>
    %c0_1 = arith.constant 0 : index
    %c0_2 = arith.constant 0 : index
    %1 = vector.load %arg2[%c0_1, %c0_2] : memref<13x128xf32, #tpu.memory_space<vmem>>, vector<13x128xf32>
    %cst = arith.constant dense<0.000000e+00> : vector<32x128xf32>
    %2 = tpu.matmul %0, %1, %cst {dimension_numbers = #tpu.dot_dimension_numbers<[1], [0], [0], [1], [0, 0, 1, 1], [], []>} : vector<32x13xf32>, vector<13x128xf32>, vector<32x128xf32> -> vector<32x128xf32>
    %c0_3 = arith.constant 0 : index
    %c0_4 = arith.constant 0 : index
    %3 = vector.load %arg3[%c0_3, %c0_4] : memref<1x128xf32, #tpu.memory_space<vmem>>, vector<1x128xf32>
    %4 = vector.broadcast %3 : vector<1x128xf32> to vector<32x128xf32>
    %5 = arith.addf %2, %4 : vector<32x128xf32>
    %cst_5 = arith.constant 0.000000e+00 : f32
    %6 = vector.broadcast %cst_5 : f32 to vector<32x128xf32>
    %7 = arith.maximumf %5, %6 : vector<32x128xf32>
    %c0_6 = arith.constant 0 : index
    %c0_7 = arith.constant 0 : index
    %8 = vector.load %arg4[%c0_6, %c0_7] : memref<128x128xf32, #tpu.memory_space<vmem>>, vector<128x128xf32>
    %cst_8 = arith.constant dense<0.000000e+00> : vector<32x128xf32>
    %9 = tpu.matmul %7, %8, %cst_8 {dimension_numbers = #tpu.dot_dimension_numbers<[1], [0], [0], [1], [0, 0, 1, 1], [], []>} : vector<32x128xf32>, vector<128x128xf32>, vector<32x128xf32> -> vector<32x128xf32>
    %c0_9 = arith.constant 0 : index
    %c0_10 = arith.constant 0 : index
    %10 = vector.load %arg5[%c0_9, %c0_10] : memref<1x128xf32, #tpu.memory_space<vmem>>, vector<1x128xf32>
    %11 = vector.broadcast %10 : vector<1x128xf32> to vector<32x128xf32>
    %12 = arith.addf %9, %11 : vector<32x128xf32>
    %c0_11 = arith.constant 0 : index
    %c0_12 = arith.constant 0 : index
    %13 = vector.load %arg6[%c0_11, %c0_12] : memref<32x128xf32, #tpu.memory_space<vmem>>, vector<32x128xf32>
    tpu.vector_store %arg6[%c0_11, %c0_12], %12 {strides = array<i32>} : memref<32x128xf32, #tpu.memory_space<vmem>>, vector<32x128xf32>,
    return
  }
  func.func @transform_0(%arg0: i32) -> (i32, i32) {
    %c0_i32 = arith.constant 0 : i32
    %c0_i32_0 = arith.constant 0 : i32
    return %arg0, %c0_i32 : i32, i32
  }
  func.func @transform_1(%arg0: i32) -> (i32, i32) {
    %c0_i32 = arith.constant 0 : i32
    %c0_i32_0 = arith.constant 0 : i32
    %c0_i32_1 = arith.constant 0 : i32
    return %c0_i32, %c0_i32_0 : i32, i32
  }
  func.func @transform_2(%arg0: i32) -> (i32, i32) {
    %c0_i32 = arith.constant 0 : i32
    %c0_i32_0 = arith.constant 0 : i32
    %c0_i32_1 = arith.constant 0 : i32
    return %c0_i32, %c0_i32_0 : i32, i32
  }
  func.func @transform_3(%arg0: i32) -> (i32, i32) {
    %c0_i32 = arith.constant 0 : i32
    %c0_i32_0 = arith.constant 0 : i32
    %c0_i32_1 = arith.constant 0 : i32
    return %c0_i32, %c0_i32_0 : i32, i32
  }
  func.func @transform_4(%arg0: i32) -> (i32, i32) {
    %c0_i32 = arith.constant 0 : i32
    %c0_i32_0 = arith.constant 0 : i32
    %c0_i32_1 = arith.constant 0 : i32
    return %c0_i32, %c0_i32_0 : i32, i32
  }
  func.func @transform_5(%arg0: i32) -> (i32, i32) {
    %c0_i32 = arith.constant 0 : i32
    %c0_i32_0 = arith.constant 0 : i32
    return %arg0, %c0_i32 : i32, i32
  }
}

</mosaic_0001>

<bundles_post_ra>
// kernel: tpu_custom_call.1
= control target key start
LH: loop header
LB: loop body
LE: loop exit
PB: predicated region body
PF: predicated region fallthrough
CT: control target
= control target key end

     0   :  { %10 = vsyncpa [#allocation3], 0  ;;  %s486_s0 = inlined_call_operand.vmem [shape: f32[32,13], index: 0, kind: input, shape index: {}]   ;;  %s487_s1 = inlined_call_operand.vmem [shape: f32[13,128], index: 1, kind: input, shape index: {}]   ;;  %s488_s2 = inlined_call_operand.vmem [shape: f32[1,128], index: 2, kind: input, shape index: {}]   ;;  %s489_s3 = inlined_call_operand.hbm [shape: f32[128,128], index: 3, kind: input, shape index: {}]   ;;  %s490_s4 = inlined_call_operand.vmem [shape: f32[1,128], index: 4, kind: input, shape index: {}]   ;;  %s491_s5 = inlined_call_operand.hbm [shape: f32[32,128], index: 5, kind: output, shape index: {}]  }
   0x1   :  { %11 = vsyncpa [#allocation4], 0  ;;  %s412_s18 = smov [#allocation2]  }
   0x2   :  { %s23_s19 = sshll.u32 %s412_s18, 4  ;;  %s24_s19 = int_to_ptr.vmem [resolvable:$true] %s23_s19 }
   0x3   :  { %s376_s20 = scalar_lea.vmem %s24_s19, 2048  ;;  %p381_p1 = scmp.lt.s32.totalorder %s24_s19, %s24_s19 }
   0x4   :  { %p377_p0 = scmp.ne.s32.totalorder %s24_s19, %s376_s20  ;;  %p382_p2 = scmp.lt.s32.totalorder %s376_s20, %s376_s20 }
   0x6   :  { %p383_p3 = por %p382_p2, %p381_p1 }
   0x8   :  { %p384_p4 = pnand %p383_p3, %p377_p0 }
   0xa   :  { %387 = shalt.err (!%p384_p4)
}
   0xb   :  { %s413_s21 = smov 128   ;;  %s414_s22 = smov 8  }
   0xc   :  { %29 = dma.hbm_to_vmem [thread:$0]  %s489_s3, 2048, %s24_s19, [#allocation3], %s413_s21, %s413_s21, %s414_s22  }
   0xd   :  { %408 = dma.done.wait [#allocation3], 2048  }
   0xe   :  { %409 = vsyncadd [#allocation3], 4294965248  ;;  %vm61_vm0 = vcmask 1044480   ;;  %vm48_vm1 = vcmask 105472   ;;  %v40_v0 = vld [vmem:[%s487_s1 + $0x8] sm:$0x1f] }
   0xf   :  { %v39_v1 = vld [vmem:[%s487_s1] sm:$0xff]  ;;  %316 = vmatprep.subr.msk.mxu0 %vm61_vm0, %v40_v0  ;;  %v36_v3 = vld [vmem:[%s486_s0 + $0x8] sm:$0xff]  ;;  %v169_v4 = vld [vmem:[#allocation2 + $0x78] sm:$0xff] }
  0x10   :  { %v35_v2 = vld [vmem:[%s486_s0] sm:$0xff]  ;;  %317 = vmatpush3.msk.msra.mxu0 %vm61_vm0, %v40_v0  ;;  %v168_v5 = vld [vmem:[#allocation2 + $0x70] sm:$0xff]  ;;  %326 = vmatprep.subr.mxu1 %v169_v4  ;;  %v167_v7 = vld [vmem:[#allocation2 + $0x68] sm:$0xff] }
  0x11   :  { %320 = vmatprep.mubr.msk.f32.mxu0 %vm48_vm1, %v35_v2  ;;  %318 = vmatprep.subr.mxu0 %v39_v1  ;;  %v37_v6 = vld [vmem:[%s486_s0 + $0x10] sm:$0xff]  ;;  %v38_v8 = vld [vmem:[%s486_s0 + $0x18] sm:$0xff]  ;;  %v166_v9 = vld [vmem:[#allocation2 + $0x60] sm:$0xff] }
  0x12   :  { %319 = vmatpush3.msra.mxu0 %v39_v1  ;;  %327 = vmatpush3.msra.mxu1 %v169_v4  ;;  %v165_v10 = vld [vmem:[#allocation2 + $0x58] sm:$0xff]  ;;  %v164_v11 = vld [vmem:[#allocation2 + $0x50] sm:$0xff]  ;;  %v163_v12 = vld [vmem:[#allocation2 + $0x48] sm:$0xff] }
  0x13   :  { %321 = vmatmul.mubr.msk.f32.vlgmr.msra.gmra.mxu0 %vm48_vm1, %v36_v3  ;;  %328 = vmatprep.subr.mxu1 %v168_v5  ;;  %v162_v13 = vld [vmem:[#allocation2 + $0x40] sm:$0xff]  ;;  %v161_v14 = vld [vmem:[#allocation2 + $0x38] sm:$0xff]  ;;  %v160_v15 = vld [vmem:[#allocation2 + $0x30] sm:$0xff] }
  0x14   :  { %323 = vmatprep.mubr.msk.f32.mxu0 %vm48_vm1, %v37_v6  ;;  %329 = vmatpush3.msra.mxu1 %v168_v5  ;;  %v159_v16 = vld [vmem:[#allocation2 + $0x28] sm:$0xff]  ;;  %v158_v17 = vld [vmem:[#allocation2 + $0x20] sm:$0xff]  ;;  %v157_v18 = vld [vmem:[#allocation2 + $0x18] sm:$0xff] }
  0x15   :  { %330 = vmatprep.subr.mxu1 %v167_v7  ;;  %v156_v19 = vld [vmem:[#allocation2 + $0x10] sm:$0xff]  ;;  %v155_v20 = vld [vmem:[#allocation2 + $0x8] sm:$0xff]  ;;  %v154_v21 = vld [vmem:[#allocation2] sm:$0xff] }
  0x16   :  { %331 = vmatpush3.msra.mxu1 %v167_v7  ;;  %v283_v22 = vld [vmem:[%s488_s2] ss:$0 sm:$0xff]  ;;  %s415_s2 = smov [#allocation5]  }
  0x17   :  { %324 = vmatmul.mubr.msk.f32.gmra.mxu0 %vm48_vm1, %v38_v8  ;;  %332 = vmatprep.subr.mxu1 %v166_v9  ;;  %v289_v35 = vld [vmem:[%s490_s4] ss:$0 sm:$0xff]  ;;  %s271_s13 = sshll.u32 %s415_s2, 4  ;;  %s272_s13 = int_to_ptr.vmem [resolvable:$true] %s271_s13 }
  0x18   :  { %333 = vmatpush3.msra.mxu1 %v166_v9  ;;  %s388_s14 = scalar_lea.vmem %s272_s13, 512  ;;  %p393_p6 = scmp.lt.s32.totalorder %s272_s13, %s272_s13 }
  0x19   :  { %334 = vmatprep.subr.mxu1 %v165_v10  ;;  %p389_p5 = scmp.ne.s32.totalorder %s272_s13, %s388_s14  ;;  %p394_p7 = scmp.lt.s32.totalorder %s388_s14, %s388_s14 }
  0x1a   :  { %335 = vmatpush3.msra.mxu1 %v165_v10 }
  0x1b   :  { %336 = vmatprep.subr.mxu1 %v164_v11  ;;  %p395_p8 = por %p394_p7, %p393_p6 }
  0x1c   :  { %337 = vmatpush3.msra.mxu1 %v164_v11 }
  0x1d   :  { %338 = vmatprep.subr.mxu1 %v163_v12  ;;  %p396_p9 = pnand %p395_p8, %p389_p5 }
  0x1e   :  { %339 = vmatpush3.msra.mxu1 %v163_v12 }
  0x1f   :  { %340 = vmatprep.subr.mxu1 %v162_v13 }
  0x20   :  { %341 = vmatpush3.msra.mxu1 %v162_v13 }
  0x21   :  { %342 = vmatprep.subr.mxu1 %v161_v14 }
  0x22   :  { %343 = vmatpush3.msra.mxu1 %v161_v14 }
  0x23   :  { %344 = vmatprep.subr.mxu1 %v160_v15 }
  0x24   :  { %345 = vmatpush3.msra.mxu1 %v160_v15 }
  0x25   :  { %346 = vmatprep.subr.mxu1 %v159_v16 }
  0x26   :  { %347 = vmatpush3.msra.mxu1 %v159_v16 }
  0x27   :  { %348 = vmatprep.subr.mxu1 %v158_v17 }
  0x28   :  { %349 = vmatpush3.msra.mxu1 %v158_v17 }
  0x29   :  { %350 = vmatprep.subr.mxu1 %v157_v18 }
  0x2a   :  { %351 = vmatpush3.msra.mxu1 %v157_v18 }
  0x2b   :  { %352 = vmatprep.subr.mxu1 %v156_v19 }
  0x2c   :  { %353 = vmatpush3.msra.mxu1 %v156_v19 }
  0x2d   :  { %354 = vmatprep.subr.mxu1 %v155_v20 }
  0x2e   :  { %355 = vmatpush3.msra.mxu1 %v155_v20 }
  0x2f   :  { %356 = vmatprep.subr.mxu1 %v154_v21 }
  0x30   :  { %357 = vmatpush3.msra.mxu1 %v154_v21 }
  0xd3   :  { %v322_v23 = vpop.f32.mrf.mxu0 }
  0xd4   :  { %v137_v24 = vadd.f32 %v322_v23, %v283_v22 }
  0xd5   :  { %v131_v25 = vpop.f32.mrf.mxu0 }
  0xd6   :  { %v132_v26 = vadd.f32 %v283_v22, %v131_v25  ;;  %v151_v29 = vmax.f32 %v137_v24, 0.0 }
  0xd7   :  { %v325_v27 = vpop.f32.mrf.mxu0 }
  0xd8   :  { %v150_v28 = vmax.f32 %v132_v26, 0.0  ;;  %v147_v30 = vadd.f32 %v325_v27, %v283_v22 }
  0xd9   :  { %v141_v31 = vpop.f32.mrf.mxu0 }
  0xda   :  { %v142_v32 = vadd.f32 %v283_v22, %v141_v31  ;;  %358 = vmatprep.mubr.f32.mxu1 %v150_v28  ;;  %v153_v34 = vmax.f32 %v147_v30, 0.0 }
  0xdb   :  { %359 = vmatmul.mubr.f32.vlgmr.msra.gmra.mxu1 %v151_v29 }
  0xdc   :  { %v152_v33 = vmax.f32 %v142_v32, 0.0 }
  0xde   :  { %361 = vmatprep.mubr.f32.mxu1 %v152_v33 }
  0xdf   :  { %362 = vmatmul.mubr.f32.gmra.mxu1 %v153_v34 }
 0x19b   :  { %v360_v36 = vpop.f32.mrf.mxu1 }
 0x19c   :  { %v249_v37 = vadd.f32 %v360_v36, %v289_v35 }
 0x19d   :  { %v243_v38 = vpop.f32.mrf.mxu1 }
 0x19e   :  { %263 = vst [vmem:[#allocation5 + $0x8] sm:$0xff] %v249_v37  ;;  %v244_v39 = vadd.f32 %v289_v35, %v243_v38 }
 0x19f   :  { %v363_v40 = vpop.f32.mrf.mxu1 }
 0x1a0   :  { %262 = vst [vmem:[#allocation5] sm:$0xff] %v244_v39  ;;  %v259_v41 = vadd.f32 %v363_v40, %v289_v35 }
 0x1a1   :  { %v253_v42 = vpop.f32.mrf.mxu1 }
 0x1a2   :  { %265 = vst [vmem:[#allocation5 + $0x18] sm:$0xff] %v259_v41  ;;  %v254_v43 = vadd.f32 %v289_v35, %v253_v42 }
 0x1a4   :  { %264 = vst [vmem:[#allocation5 + $0x10] sm:$0xff] %v254_v43 }
 0x1a5   :  { %399 = shalt.err (!%p396_p9)
}
 0x1a6   :  { %277 = dma.vmem_to_hbm [thread:$0]  %s272_s13, 512, %s491_s5, [#allocation4], %s413_s21, %s413_s21, %s414_s22  }
 0x1a7   :  { %410 = dma.done.wait [#allocation4], 512  }
 0x1a8   :  { %411 = vsyncadd [#allocation4], 4294966784 }
 0x1a9   :  { %281 = vsyncpa [#allocation3], 1 }
 0x1aa   :  { %282 = vsyncpa [#allocation4], 1 }

</bundles_post_ra>
